<compile_context>
chip_gen: v6e
topology: v6e:2x2x1
jax: 0.10.0
libtpu: 0.0.40
codegen_flags: <defaults>
</compile_context>

<pallas_src>
import jax
import jax.numpy as jnp
from jax.experimental import pallas as pl
from jax.experimental.pallas import tpu as pltpu

EPS = 1e-5
NEG_SLOPE = 0.2
HIDDEN = 32


def _replicated_spec(shape):
    """Full-array block, always mapped to block (0,...,0). Binds ndim by value."""
    nd = len(shape)
    return pl.BlockSpec(shape, lambda *_, _nd=nd: (0,) * _nd)


# ---------------------------------------------------------------------------
# Path A: fully fused single-block kernel (small / moderate batches that fit
# VMEM; at demo shapes the call is launch-overhead bound anyway).
# ---------------------------------------------------------------------------
def _bn_lrelu(h, gamma, beta):
    """Training-mode BatchNorm1d (biased var) + LeakyReLU(0.2), fused form."""
    mean = jnp.mean(h, axis=0, keepdims=True)
    centered = h - mean
    var = jnp.mean(centered * centered, axis=0, keepdims=True)
    scale = gamma * jax.lax.rsqrt(var + EPS)          # rsqrt -> EUP slot (free)
    h = centered * scale + beta
    return jnp.maximum(h, NEG_SLOPE * h)              # cheaper than cmp+select


def _generator_fused_kernel(
    x_ref,
    w1_ref, g1_ref, be1_ref,
    w2_ref, g2_ref, be2_ref,
    w3_ref, g3_ref, be3_ref,
    w4_ref, b4_ref,
    o_ref,
):
    # b1..b3 intentionally absent (cancelled by training-mode BN mean subtract).
    h = jnp.dot(x_ref[...], w1_ref[...], preferred_element_type=jnp.float32)
    h = _bn_lrelu(h, g1_ref[...], be1_ref[...])

    h = jnp.dot(h.astype(jnp.bfloat16), w2_ref[...],
                preferred_element_type=jnp.float32)
    h = _bn_lrelu(h, g2_ref[...], be2_ref[...])

    h = jnp.dot(h.astype(jnp.bfloat16), w3_ref[...],
                preferred_element_type=jnp.float32)
    h = _bn_lrelu(h, g3_ref[...], be3_ref[...])

    out = jnp.dot(h.astype(jnp.bfloat16), w4_ref[...],
                  preferred_element_type=jnp.float32)
    # NOTE: sign_dim < 128 => masked stores; only worth padding w4 to a
    # lane-dense 128-wide output at large batch (see tiled path comment).
    o_ref[...] = (out + b4_ref[...]).astype(o_ref.dtype)


def generator_forward_fused(x, params):
    B = x.shape[0]
    sign_dim = params["w4"].shape[1]

    args = (
        x.astype(jnp.bfloat16),
        params["w1"].astype(jnp.bfloat16), params["g1"], params["be1"],
        params["w2"].astype(jnp.bfloat16), params["g2"], params["be2"],
        params["w3"].astype(jnp.bfloat16), params["g3"], params["be3"],
        params["w4"].astype(jnp.bfloat16), params["b4"],
    )

    in_specs = [_replicated_spec(a.shape) for a in args]
    out_spec = pl.BlockSpec((B, sign_dim), lambda *_: (0, 0))

    return pl.pallas_call(
        _generator_fused_kernel,
        out_shape=jax.ShapeDtypeStruct((B, sign_dim), jnp.float32),
        grid=(),
        in_specs=in_specs,
        out_specs=out_spec,
        compiler_params=pltpu.CompilerParams(
            # v5e scoped-VMEM default is 16 MiB; 32 MiB is safe on v5e/v6e/v7x.
            # For batches that would need more, use generator_forward_tiled.
            vmem_limit_bytes=32 * 1024 * 1024,
        ),
    )(*args)


# ---------------------------------------------------------------------------
# Path B: batch-tiled pipeline for production batch sizes.
#   Each pass: grid=(B//TB,), batch axis "parallel" (megacore on v7x), BlockSpec
#   double-buffers the (TB, F) activation stream.  Training-mode BN couples all
#   rows, so each pass also emits per-tile partial sum/sumsq (phase 1); the
#   tiny (1,32) scale/shift reduction happens between passes in plain JAX, and
#   the next pass fuses normalize + LeakyReLU + next matmul (phase 2).
# ---------------------------------------------------------------------------
def _linear_stats_kernel(x_ref, w_ref, h_ref, s_ref, ss_ref):
    h = jnp.dot(x_ref[...], w_ref[...], preferred_element_type=jnp.float32)
    h_ref[...] = h
    f = h.shape[1]
    s_ref[...] = jnp.sum(h, axis=0, keepdims=True).reshape(1, 1, f)
    ss_ref[...] = jnp.sum(h * h, axis=0, keepdims=True).reshape(1, 1, f)


def _bn_lrelu_linear_stats_kernel(h_ref, sc_ref, sh_ref, w_ref,
                                  o_ref, s_ref, ss_ref):
    h = h_ref[...] * sc_ref[...] + sh_ref[...]
    h = jnp.maximum(h, NEG_SLOPE * h)
    o = jnp.dot(h.astype(jnp.bfloat16), w_ref[...],
                preferred_element_type=jnp.float32)
    o_ref[...] = o
    f = o.shape[1]
    s_ref[...] = jnp.sum(o, axis=0, keepdims=True).reshape(1, 1, f)
    ss_ref[...] = jnp.sum(o * o, axis=0, keepdims=True).reshape(1, 1, f)


def _bn_lrelu_linear_bias_kernel(h_ref, sc_ref, sh_ref, w_ref, b_ref, o_ref):
    h = h_ref[...] * sc_ref[...] + sh_ref[...]
    h = jnp.maximum(h, NEG_SLOPE * h)
    o = jnp.dot(h.astype(jnp.bfloat16), w_ref[...],
                preferred_element_type=jnp.float32)
    o_ref[...] = (o + b_ref[...]).astype(o_ref.dtype)


_PARALLEL = pltpu.CompilerParams(dimension_semantics=("parallel",))


def _linear_stats(x, w, tb):
    B, T, F = x.shape[0], x.shape[0] // tb, w.shape[1]
    return pl.pallas_call(
        _linear_stats_kernel,
        out_shape=(
            jax.ShapeDtypeStruct((B, F), jnp.float32),
            jax.ShapeDtypeStruct((T, 1, F), jnp.float32),
            jax.ShapeDtypeStruct((T, 1, F), jnp.float32),
        ),
        grid=(T,),
        in_specs=[
            pl.BlockSpec((tb, x.shape[1]), lambda i: (i, 0)),
            _replicated_spec(w.shape),
        ],
        out_specs=(
            pl.BlockSpec((tb, F), lambda i: (i, 0)),
            pl.BlockSpec((1, 1, F), lambda i: (i, 0, 0)),
            pl.BlockSpec((1, 1, F), lambda i: (i, 0, 0)),
        ),
        compiler_params=_PARALLEL,
    )(x, w)


def _bn_lrelu_linear_stats(h, scale, shift, w, tb):
    B, T, F = h.shape[0], h.shape[0] // tb, w.shape[1]
    return pl.pallas_call(
        _bn_lrelu_linear_stats_kernel,
        out_shape=(
            jax.ShapeDtypeStruct((B, F), jnp.float32),
            jax.ShapeDtypeStruct((T, 1, F), jnp.float32),
            jax.ShapeDtypeStruct((T, 1, F), jnp.float32),
        ),
        grid=(T,),
        in_specs=[
            pl.BlockSpec((tb, h.shape[1]), lambda i: (i, 0)),
            _replicated_spec(scale.shape),
            _replicated_spec(shift.shape),
            _replicated_spec(w.shape),
        ],
        out_specs=(
            pl.BlockSpec((tb, F), lambda i: (i, 0)),
            pl.BlockSpec((1, 1, F), lambda i: (i, 0, 0)),
            pl.BlockSpec((1, 1, F), lambda i: (i, 0, 0)),
        ),
        compiler_params=_PARALLEL,
    )(h, scale, shift, w)


def _bn_lrelu_linear_bias(h, scale, shift, w, b, tb):
    B, T, F = h.shape[0], h.shape[0] // tb, w.shape[1]
    return pl.pallas_call(
        _bn_lrelu_linear_bias_kernel,
        out_shape=jax.ShapeDtypeStruct((B, F), jnp.float32),
        grid=(T,),
        in_specs=[
            pl.BlockSpec((tb, h.shape[1]), lambda i: (i, 0)),
            _replicated_spec(scale.shape),
            _replicated_spec(shift.shape),
            _replicated_spec(w.shape),
            _replicated_spec(b.shape),
        ],
        out_specs=pl.BlockSpec((tb, F), lambda i: (i, 0)),
        compiler_params=_PARALLEL,
    )(h, scale, shift, w, b)


def _bn_scale_shift(s, ss, gamma, beta, batch):
    """Reduce per-tile partial stats -> fused BN scale/shift (tiny (1,32) math)."""
    s_tot = jnp.sum(s, axis=0)                      # (1, F)
    ss_tot = jnp.sum(ss, axis=0)                    # (1, F)
    mean = s_tot / batch
    var = jnp.maximum(ss_tot / batch - mean * mean, 0.0)   # biased batch var
    scale = gamma * jax.lax.rsqrt(var + EPS)
    shift = beta - mean * scale
    return scale, shift


def generator_forward_tiled(x, params, batch_tile=512):
    """Batch-tiled forward.  For production, use batch_tile ~512-2048 rows."""
    B = x.shape[0]
    assert B % batch_tile == 0 and batch_tile % 8 == 0, "tile must divide B, %8==0"

    xb = x.astype(jnp.bfloat16)
    w1 = params["w1"].astype(jnp.bfloat16)
    w2 = params["w2"].astype(jnp.bfloat16)
    w3 = params["w3"].astype(jnp.bfloat16)
    w4 = params["w4"].astype(jnp.bfloat16)

    h1, s1, ss1 = _linear_stats(xb, w1, batch_tile)
    sc1, sh1 = _bn_scale_shift(s1, ss1, params["g1"], params["be1"], B)

    h2, s2, ss2 = _bn_lrelu_linear_stats(h1, sc1, sh1, w2, batch_tile)
    sc2, sh2 = _bn_scale_shift(s2, ss2, params["g2"], params["be2"], B)

    h3, s3, ss3 = _bn_lrelu_linear_stats(h2, sc2, sh2, w3, batch_tile)
    sc3, sh3 = _bn_scale_shift(s3, ss3, params["g3"], params["be3"], B)

    return _bn_lrelu_linear_bias(h3, sc3, sh3, w4, params["b4"], batch_tile)


def generator_forward(x, params, batch_tile=None):
    """Dispatch: single fused kernel when the batch fits / no tile requested."""
    if batch_tile is None or x.shape[0] <= batch_tile:
        return generator_forward_fused(x, params)
    return generator_forward_tiled(x, params, batch_tile)


# ---------------------------------------------------------------------------
# Params / reference
# ---------------------------------------------------------------------------
def init_params(key, input_dim, sign_dim, hidden=HIDDEN):
    """PyTorch-ish uniform fan-in init.  Linear weights stored transposed as
    (in_features, out_features) so kernels compute x @ W directly.  b1..b3 are
    kept (module fidelity / reference) but the kernels drop them: they are
    exactly cancelled by training-mode BatchNorm's mean subtraction."""
    keys = jax.random.split(key, 8)

    def linear(kw, kb, fan_in, fan_out):
        bound = 1.0 / jnp.sqrt(fan_in)
        w = jax.random.uniform(kw, (fan_in, fan_out), jnp.float32, -bound, bound)
        b = jax.random.uniform(kb, (1, fan_out), jnp.float32, -bound, bound)
        return w, b

    w1, b1 = linear(keys[0], keys[1], input_dim, hidden)
    w2, b2 = linear(keys[2], keys[3], hidden, hidden)
    w3, b3 = linear(keys[4], keys[5], hidden, hidden)
    w4, b4 = linear(keys[6], keys[7], hidden, sign_dim)

    ones = jnp.ones((1, hidden), jnp.float32)
    zeros = jnp.zeros((1, hidden), jnp.float32)

    return dict(
        w1=w1, b1=b1, g1=ones, be1=zeros,
        w2=w2, b2=b2, g2=ones, be2=zeros,
        w3=w3, b3=b3, g3=ones, be3=zeros,
        w4=w4, b4=b4,
    )


def _reference_forward(x, p, matmul_dtype=jnp.float32):
    """Pure-JAX reference (training-mode BN, includes the b1..b3 biases).
    matmul_dtype=bf16 mirrors the kernels' MXU operand precision."""

    def dot(a, w):
        return jnp.dot(a.astype(matmul_dtype), w.astype(matmul_dtype),
                       preferred_element_type=jnp.float32)

    def bn_lrelu(h, g, be):
        m = jnp.mean(h, axis=0, keepdims=True)
        v = jnp.mean((h - m) ** 2, axis=0, keepdims=True)
        h = (h - m) / jnp.sqrt(v + EPS) * g + be
        return jnp.where(h > 0, h, NEG_SLOPE * h)

    h = bn_lrelu(dot(x, p["w1"]) + p["b1"], p["g1"], p["be1"])
    h = bn_lrelu(dot(h, p["w2"]) + p["b2"], p["g2"], p["be2"])
    h = bn_lrelu(dot(h, p["w3"]) + p["b3"], p["g3"], p["be3"])
    return dot(h, p["w4"]) + p["b4"]


if __name__ == "__main__":
    key = jax.random.PRNGKey(0)
    k_param, k_x1, k_x2 = jax.random.split(key, 3)

    input_dim, sign_dim = 16, 8
    params = init_params(k_param, input_dim, sign_dim)

    # --- Path A: fused single-block kernel at the demo shape (B=8) ----------
    x_small = jax.random.normal(k_x1, (8, input_dim), jnp.float32)
    out_small = jax.block_until_ready(generator_forward(x_small, params))
    assert out_small.shape == (8, sign_dim)
    assert jnp.allclose(out_small,
                        _reference_forward(x_small, params, jnp.bfloat16),
                        atol=5e-3, rtol=5e-3)
    assert jnp.allclose(out_small,
                        _reference_forward(x_small, params, jnp.float32),
                        atol=1e-1, rtol=1e-1)

    # --- Path B: batch-tiled two-phase-BN pipeline (small multi-tile test) ---
    x_big = jax.random.normal(k_x2, (128, input_dim), jnp.float32)
    out_big = jax.block_until_ready(
        generator_forward(x_big, params, batch_tile=32))
    assert out_big.shape == (128, sign_dim)
    assert jnp.allclose(out_big,
                        _reference_forward(x_big, params, jnp.bfloat16),
                        atol=5e-3, rtol=5e-3)
    assert jnp.allclose(out_big,
                        _reference_forward(x_big, params, jnp.float32),
                        atol=1e-1, rtol=1e-1)

    print("KERNEL_OK")
</pallas_src>

<mosaic_0001>
module attributes {stable_mosaic.version = 11 : i64} {
  func.func @_generator_fused_kernel(%arg0: memref<8x16xbf16, #tpu.memory_space<vmem>>, %arg1: memref<16x32xbf16, #tpu.memory_space<vmem>>, %arg2: memref<1x32xf32, #tpu.memory_space<vmem>>, %arg3: memref<1x32xf32, #tpu.memory_space<vmem>>, %arg4: memref<32x32xbf16, #tpu.memory_space<vmem>>, %arg5: memref<1x32xf32, #tpu.memory_space<vmem>>, %arg6: memref<1x32xf32, #tpu.memory_space<vmem>>, %arg7: memref<32x32xbf16, #tpu.memory_space<vmem>>, %arg8: memref<1x32xf32, #tpu.memory_space<vmem>>, %arg9: memref<1x32xf32, #tpu.memory_space<vmem>>, %arg10: memref<32x8xbf16, #tpu.memory_space<vmem>>, %arg11: memref<1x8xf32, #tpu.memory_space<vmem>>, %arg12: memref<8x8xf32, #tpu.memory_space<vmem>>) attributes {dimension_semantics = [], scalar_prefetch = 0 : i64, scratch_operands = 0 : i64, tpu.core_type = #tpu.core_type<tc>} {
    %c0 = arith.constant 0 : index
    %c0_0 = arith.constant 0 : index
    %0 = vector.load %arg0[%c0, %c0_0] : memref<8x16xbf16, #tpu.memory_space<vmem>>, vector<8x16xbf16>
    %c0_1 = arith.constant 0 : index
    %c0_2 = arith.constant 0 : index
    %1 = vector.load %arg1[%c0_1, %c0_2] : memref<16x32xbf16, #tpu.memory_space<vmem>>, vector<16x32xbf16>
    %cst = arith.constant dense<0.000000e+00> : vector<8x32xf32>
    %2 = tpu.matmul %0, %1, %cst {dimension_numbers = #tpu.dot_dimension_numbers<[1], [0], [0], [1], [0, 0, 1, 1], [], []>} : vector<8x16xbf16>, vector<16x32xbf16>, vector<8x32xf32> -> vector<8x32xf32>
    %c0_3 = arith.constant 0 : index
    %c0_4 = arith.constant 0 : index
    %3 = vector.load %arg2[%c0_3, %c0_4] : memref<1x32xf32, #tpu.memory_space<vmem>>, vector<1x32xf32>
    %c0_5 = arith.constant 0 : index
    %c0_6 = arith.constant 0 : index
    %4 = vector.load %arg3[%c0_5, %c0_6] : memref<1x32xf32, #tpu.memory_space<vmem>>, vector<1x32xf32>
    %cst_7 = arith.constant dense<0.000000e+00> : vector<32xf32>
    %5 = vector.multi_reduction <add>, %2, %cst_7 [0] : vector<8x32xf32> to vector<32xf32>
    %6 = vector.shape_cast %5 : vector<32xf32> to vector<1x32xf32>
    %cst_8 = arith.constant 8.000000e+00 : f32
    %7 = vector.broadcast %cst_8 : f32 to vector<1x32xf32>
    %8 = arith.divf %6, %7 : vector<1x32xf32>
    %9 = vector.broadcast %8 : vector<1x32xf32> to vector<8x32xf32>
    %10 = arith.subf %2, %9 : vector<8x32xf32>
    %11 = arith.mulf %10, %10 : vector<8x32xf32>
    %cst_9 = arith.constant dense<0.000000e+00> : vector<32xf32>
    %12 = vector.multi_reduction <add>, %11, %cst_9 [0] : vector<8x32xf32> to vector<32xf32>
    %13 = vector.shape_cast %12 : vector<32xf32> to vector<1x32xf32>
    %cst_10 = arith.constant 8.000000e+00 : f32
    %14 = vector.broadcast %cst_10 : f32 to vector<1x32xf32>
    %15 = arith.divf %13, %14 : vector<1x32xf32>
    %cst_11 = arith.constant 9.99999974E-6 : f32
    %16 = vector.broadcast %cst_11 : f32 to vector<1x32xf32>
    %17 = arith.addf %15, %16 : vector<1x32xf32>
    %18 = math.rsqrt %17 : vector<1x32xf32>
    %19 = arith.mulf %3, %18 : vector<1x32xf32>
    %20 = vector.broadcast %19 : vector<1x32xf32> to vector<8x32xf32>
    %21 = arith.mulf %10, %20 : vector<8x32xf32>
    %22 = vector.broadcast %4 : vector<1x32xf32> to vector<8x32xf32>
    %23 = arith.addf %21, %22 : vector<8x32xf32>
    %cst_12 = arith.constant 2.000000e-01 : f32
    %24 = vector.broadcast %cst_12 : f32 to vector<8x32xf32>
    %25 = arith.mulf %24, %23 : vector<8x32xf32>
    %26 = arith.maximumf %23, %25 : vector<8x32xf32>
    %27 = arith.truncf %26 : vector<8x32xf32> to vector<8x32xbf16>
    %c0_13 = arith.constant 0 : index
    %c0_14 = arith.constant 0 : index
    %28 = vector.load %arg4[%c0_13, %c0_14] : memref<32x32xbf16, #tpu.memory_space<vmem>>, vector<32x32xbf16>
    %cst_15 = arith.constant dense<0.000000e+00> : vector<8x32xf32>
    %29 = tpu.matmul %27, %28, %cst_15 {dimension_numbers = #tpu.dot_dimension_numbers<[1], [0], [0], [1], [0, 0, 1, 1], [], []>} : vector<8x32xbf16>, vector<32x32xbf16>, vector<8x32xf32> -> vector<8x32xf32>
    %c0_16 = arith.constant 0 : index
    %c0_17 = arith.constant 0 : index
    %30 = vector.load %arg5[%c0_16, %c0_17] : memref<1x32xf32, #tpu.memory_space<vmem>>, vector<1x32xf32>
    %c0_18 = arith.constant 0 : index
    %c0_19 = arith.constant 0 : index
    %31 = vector.load %arg6[%c0_18, %c0_19] : memref<1x32xf32, #tpu.memory_space<vmem>>, vector<1x32xf32>
    %cst_20 = arith.constant dense<0.000000e+00> : vector<32xf32>
    %32 = vector.multi_reduction <add>, %29, %cst_20 [0] : vector<8x32xf32> to vector<32xf32>
    %33 = vector.shape_cast %32 : vector<32xf32> to vector<1x32xf32>
    %cst_21 = arith.constant 8.000000e+00 : f32
    %34 = vector.broadcast %cst_21 : f32 to vector<1x32xf32>
    %35 = arith.divf %33, %34 : vector<1x32xf32>
    %36 = vector.broadcast %35 : vector<1x32xf32> to vector<8x32xf32>
    %37 = arith.subf %29, %36 : vector<8x32xf32>
    %38 = arith.mulf %37, %37 : vector<8x32xf32>
    %cst_22 = arith.constant dense<0.000000e+00> : vector<32xf32>
    %39 = vector.multi_reduction <add>, %38, %cst_22 [0] : vector<8x32xf32> to vector<32xf32>
    %40 = vector.shape_cast %39 : vector<32xf32> to vector<1x32xf32>
    %cst_23 = arith.constant 8.000000e+00 : f32
    %41 = vector.broadcast %cst_23 : f32 to vector<1x32xf32>
    %42 = arith.divf %40, %41 : vector<1x32xf32>
    %cst_24 = arith.constant 9.99999974E-6 : f32
    %43 = vector.broadcast %cst_24 : f32 to vector<1x32xf32>
    %44 = arith.addf %42, %43 : vector<1x32xf32>
    %45 = math.rsqrt %44 : vector<1x32xf32>
    %46 = arith.mulf %30, %45 : vector<1x32xf32>
    %47 = vector.broadcast %46 : vector<1x32xf32> to vector<8x32xf32>
    %48 = arith.mulf %37, %47 : vector<8x32xf32>
    %49 = vector.broadcast %31 : vector<1x32xf32> to vector<8x32xf32>
    %50 = arith.addf %48, %49 : vector<8x32xf32>
    %cst_25 = arith.constant 2.000000e-01 : f32
    %51 = vector.broadcast %cst_25 : f32 to vector<8x32xf32>
    %52 = arith.mulf %51, %50 : vector<8x32xf32>
    %53 = arith.maximumf %50, %52 : vector<8x32xf32>
    %54 = arith.truncf %53 : vector<8x32xf32> to vector<8x32xbf16>
    %c0_26 = arith.constant 0 : index
    %c0_27 = arith.constant 0 : index
    %55 = vector.load %arg7[%c0_26, %c0_27] : memref<32x32xbf16, #tpu.memory_space<vmem>>, vector<32x32xbf16>
    %cst_28 = arith.constant dense<0.000000e+00> : vector<8x32xf32>
    %56 = tpu.matmul %54, %55, %cst_28 {dimension_numbers = #tpu.dot_dimension_numbers<[1], [0], [0], [1], [0, 0, 1, 1], [], []>} : vector<8x32xbf16>, vector<32x32xbf16>, vector<8x32xf32> -> vector<8x32xf32>
    %c0_29 = arith.constant 0 : index
    %c0_30 = arith.constant 0 : index
    %57 = vector.load %arg8[%c0_29, %c0_30] : memref<1x32xf32, #tpu.memory_space<vmem>>, vector<1x32xf32>
    %c0_31 = arith.constant 0 : index
    %c0_32 = arith.constant 0 : index
    %58 = vector.load %arg9[%c0_31, %c0_32] : memref<1x32xf32, #tpu.memory_space<vmem>>, vector<1x32xf32>
    %cst_33 = arith.constant dense<0.000000e+00> : vector<32xf32>
    %59 = vector.multi_reduction <add>, %56, %cst_33 [0] : vector<8x32xf32> to vector<32xf32>
    %60 = vector.shape_cast %59 : vector<32xf32> to vector<1x32xf32>
    %cst_34 = arith.constant 8.000000e+00 : f32
    %61 = vector.broadcast %cst_34 : f32 to vector<1x32xf32>
    %62 = arith.divf %60, %61 : vector<1x32xf32>
    %63 = vector.broadcast %62 : vector<1x32xf32> to vector<8x32xf32>
    %64 = arith.subf %56, %63 : vector<8x32xf32>
    %65 = arith.mulf %64, %64 : vector<8x32xf32>
    %cst_35 = arith.constant dense<0.000000e+00> : vector<32xf32>
    %66 = vector.multi_reduction <add>, %65, %cst_35 [0] : vector<8x32xf32> to vector<32xf32>
    %67 = vector.shape_cast %66 : vector<32xf32> to vector<1x32xf32>
    %cst_36 = arith.constant 8.000000e+00 : f32
    %68 = vector.broadcast %cst_36 : f32 to vector<1x32xf32>
    %69 = arith.divf %67, %68 : vector<1x32xf32>
    %cst_37 = arith.constant 9.99999974E-6 : f32
    %70 = vector.broadcast %cst_37 : f32 to vector<1x32xf32>
    %71 = arith.addf %69, %70 : vector<1x32xf32>
    %72 = math.rsqrt %71 : vector<1x32xf32>
    %73 = arith.mulf %57, %72 : vector<1x32xf32>
    %74 = vector.broadcast %73 : vector<1x32xf32> to vector<8x32xf32>
    %75 = arith.mulf %64, %74 : vector<8x32xf32>
    %76 = vector.broadcast %58 : vector<1x32xf32> to vector<8x32xf32>
    %77 = arith.addf %75, %76 : vector<8x32xf32>
    %cst_38 = arith.constant 2.000000e-01 : f32
    %78 = vector.broadcast %cst_38 : f32 to vector<8x32xf32>
    %79 = arith.mulf %78, %77 : vector<8x32xf32>
    %80 = arith.maximumf %77, %79 : vector<8x32xf32>
    %81 = arith.truncf %80 : vector<8x32xf32> to vector<8x32xbf16>
    %c0_39 = arith.constant 0 : index
    %c0_40 = arith.constant 0 : index
    %82 = vector.load %arg10[%c0_39, %c0_40] : memref<32x8xbf16, #tpu.memory_space<vmem>>, vector<32x8xbf16>
    %cst_41 = arith.constant dense<0.000000e+00> : vector<8x8xf32>
    %83 = tpu.matmul %81, %82, %cst_41 {dimension_numbers = #tpu.dot_dimension_numbers<[1], [0], [0], [1], [0, 0, 1, 1], [], []>} : vector<8x32xbf16>, vector<32x8xbf16>, vector<8x8xf32> -> vector<8x8xf32>
    %c0_42 = arith.constant 0 : index
    %c0_43 = arith.constant 0 : index
    %84 = vector.load %arg11[%c0_42, %c0_43] : memref<1x8xf32, #tpu.memory_space<vmem>>, vector<1x8xf32>
    %85 = vector.broadcast %84 : vector<1x8xf32> to vector<8x8xf32>
    %86 = arith.addf %83, %85 : vector<8x8xf32>
    %c0_44 = arith.constant 0 : index
    %c0_45 = arith.constant 0 : index
    %87 = vector.load %arg12[%c0_44, %c0_45] : memref<8x8xf32, #tpu.memory_space<vmem>>, vector<8x8xf32>
    tpu.vector_store %arg12[%c0_44, %c0_45], %86 {strides = array<i32>} : memref<8x8xf32, #tpu.memory_space<vmem>>, vector<8x8xf32>,
    return
  }
}

</mosaic_0001>

<bundles_post_ra>
// kernel: tpu_custom_call.1
= control target key start
LH: loop header
LB: loop body
LE: loop exit
PB: predicated region body
PF: predicated region fallthrough
CT: control target
= control target key end

     0   :  { %17 = vsyncpa [#allocation3], 0  ;;  %s947_s0 = inlined_call_operand.hbm [shape: bf16[8,16], index: 0, kind: input, shape index: {}]   ;;  %s948_s1 = inlined_call_operand.hbm [shape: bf16[16,32], index: 1, kind: input, shape index: {}]   ;;  %s949_s2 = inlined_call_operand.hbm [shape: f32[1,32], index: 2, kind: input, shape index: {}]   ;;  %s950_s3 = inlined_call_operand.hbm [shape: f32[1,32], index: 3, kind: input, shape index: {}]   ;;  %s951_s4 = inlined_call_operand.vmem [shape: bf16[32,32], index: 4, kind: input, shape index: {}]   ;;  %s952_s5 = inlined_call_operand.hbm [shape: f32[1,32], index: 5, kind: input, shape index: {}]   ;;  %s953_s6 = inlined_call_operand.hbm [shape: f32[1,32], index: 6, kind: input, shape index: {}]   ;;  %s954_s7 = inlined_call_operand.vmem [shape: bf16[32,32], index: 7, kind: input, shape index: {}]   ;;  %s955_s8 = inlined_call_operand.hbm [shape: f32[1,32], index: 8, kind: input, shape index: {}]   ;;  %s956_s9 = inlined_call_operand.hbm [shape: f32[1,32], index: 9, kind: input, shape index: {}]   ;;  %s957_s10 = inlined_call_operand.vmem [shape: bf16[32,8], index: 10, kind: input, shape index: {}]   ;;  %s958_s11 = inlined_call_operand.vmem [shape: f32[1,8], index: 11, kind: input, shape index: {}]   ;;  %s959_s12 = inlined_call_operand.hbm [shape: f32[8,8], index: 12, kind: output, shape index: {}]  }
   0x1   :  { %18 = vsyncpa [#allocation6], 0 }
   0x2   :  { %19 = vsyncpa [#allocation9], 0 }
   0x3   :  { %20 = vsyncpa [#allocation12], 0 }
   0x4   :  { %21 = vsyncpa [#allocation15], 0 }
   0x5   :  { %22 = vsyncpa [#allocation4], 0  ;;  %s792_s21 = smov [#allocation5]  }
   0x6   :  { %s38_s22 = sshll.u32 %s792_s21, 4  ;;  %s39_s22 = int_to_ptr.vmem [resolvable:$true] %s38_s22 }
   0x7   :  { %s608_s23 = scalar_lea.vmem %s39_s22, 128  ;;  %p613_p1 = scmp.lt.s32.totalorder %s39_s22, %s39_s22 }
   0x8   :  { %p609_p0 = scmp.ne.s32.totalorder %s39_s22, %s608_s23  ;;  %p614_p2 = scmp.lt.s32.totalorder %s608_s23, %s608_s23 }
   0xa   :  { %p615_p3 = por %p614_p2, %p613_p1 }
   0xc   :  { %p616_p4 = pnand %p615_p3, %p609_p0 }
   0xe   :  { %619 = shalt.err (!%p616_p4)
}
   0xf   :  { %s793_s24 = smov 64   ;;  %s794_s25 = smov 4  }
  0x10   :  { %44 = dma.hbm_to_vmem [thread:$0]  %s948_s1, 128, %s39_s22, [#allocation6], %s793_s24, %s793_s24, %s794_s25  }
  0x11   :  { %s795_s28 = smov [#allocation8]   ;;  %s796_s30 = smov [#allocation11]  }
  0x12   :  { %s61_s29 = sshll.u32 %s795_s28, 4  ;;  %s83_s13 = sshll.u32 %s796_s30, 4  ;;  %s62_s29 = int_to_ptr.vmem [resolvable:$true] %s61_s29  ;;  %s84_s13 = int_to_ptr.vmem [resolvable:$true] %s83_s13 }
  0x13   :  { %s628_s14 = scalar_lea.vmem %s62_s29, 16  ;;  %s632_s15 = scalar_lea.vmem %s62_s29, 32 }
  0x14   :  { %p629_p5 = scmp.ne.s32.totalorder %s62_s29, %s628_s14  ;;  %p633_p6 = scmp.lt.s32.totalorder %s62_s29, %s62_s29 }
  0x15   :  { %p634_p7 = scmp.lt.s32.totalorder %s632_s15, %s628_s14 }
  0x17   :  { %p635_p8 = por %p634_p7, %p633_p6 }
  0x19   :  { %p636_p9 = pnand %p635_p8, %p629_p5 }
  0x1b   :  { %639 = shalt.err (!%p636_p9)
}
  0x1c   :  { %64 = dma.hbm_to_vmem [thread:$0]  %s950_s3, 16, %s62_s29, [#allocation9]  }
  0x1d   :  { %s648_s18 = scalar_lea.vmem %s84_s13, 16  ;;  %s652_s1 = scalar_lea.vmem %s84_s13, 32 }
  0x1e   :  { %p649_p10 = scmp.ne.s32.totalorder %s84_s13, %s648_s18  ;;  %p653_p11 = scmp.lt.s32.totalorder %s84_s13, %s84_s13 }
  0x1f   :  { %p654_p12 = scmp.lt.s32.totalorder %s652_s1, %s648_s18 }
  0x21   :  { %p655_p13 = por %p654_p12, %p653_p11 }
  0x23   :  { %p656_p0 = pnand %p655_p13, %p649_p10 }
  0x25   :  { %659 = shalt.err (!%p656_p0)
}
  0x26   :  { %86 = dma.hbm_to_vmem [thread:$0]  %s953_s6, 16, %s84_s13, [#allocation12]  }
  0x27   :  { %s797_s21 = smov [#allocation2]   ;;  %s798_s23 = smov [#allocation7]  }
  0x28   :  { %s29_s22 = sshll.u32 %s797_s21, 4  ;;  %s51_s24 = sshll.u32 %s798_s23, 4  ;;  %s30_s22 = int_to_ptr.vmem [resolvable:$true] %s29_s22  ;;  %s52_s24 = int_to_ptr.vmem [resolvable:$true] %s51_s24 }
  0x29   :  { %s668_s25 = scalar_lea.vmem %s30_s22, 64  ;;  %p673_p2 = scmp.lt.s32.totalorder %s30_s22, %s30_s22 }
  0x2a   :  { %p669_p1 = scmp.ne.s32.totalorder %s30_s22, %s668_s25  ;;  %p674_p3 = scmp.lt.s32.totalorder %s668_s25, %s668_s25 }
  0x2c   :  { %p675_p4 = por %p674_p3, %p673_p2 }
  0x2e   :  { %p676_p5 = pnand %p675_p4, %p669_p1 }
  0x30   :  { %679 = shalt.err (!%p676_p5)
}
  0x31   :  { %32 = dma.hbm_to_vmem [thread:$0]  %s947_s0, 64, %s30_s22, [#allocation3]  }
  0x32   :  { %s688_s27 = scalar_lea.vmem %s52_s24, 16  ;;  %s692_s6 = scalar_lea.vmem %s52_s24, 32 }
  0x33   :  { %p689_p6 = scmp.ne.s32.totalorder %s52_s24, %s688_s27  ;;  %p693_p7 = scmp.lt.s32.totalorder %s52_s24, %s52_s24 }
  0x34   :  { %p694_p8 = scmp.lt.s32.totalorder %s692_s6, %s688_s27 }
  0x36   :  { %p695_p9 = por %p694_p8, %p693_p7 }
  0x38   :  { %p696_p10 = pnand %p695_p9, %p689_p6 }
  0x3a   :  { %699 = shalt.err (!%p696_p10)
}
  0x3b   :  { %54 = dma.hbm_to_vmem [thread:$0]  %s949_s2, 16, %s52_s24, [#allocation6]  }
  0x3c   :  { %s799_s30 = smov [#allocation10]   ;;  %s800_s14 = smov [#allocation13]  }
  0x3d   :  { %s73_s13 = sshll.u32 %s799_s30, 4  ;;  %s95_s15 = sshll.u32 %s800_s14, 4  ;;  %s74_s13 = int_to_ptr.vmem [resolvable:$true] %s73_s13  ;;  %s96_s15 = int_to_ptr.vmem [resolvable:$true] %s95_s15 }
  0x3e   :  { %s708_s16 = scalar_lea.vmem %s74_s13, 16  ;;  %s712_s0 = scalar_lea.vmem %s74_s13, 32 }
  0x3f   :  { %p709_p11 = scmp.ne.s32.totalorder %s74_s13, %s708_s16  ;;  %p713_p12 = scmp.lt.s32.totalorder %s74_s13, %s74_s13 }
  0x40   :  { %p714_p13 = scmp.lt.s32.totalorder %s712_s0, %s708_s16 }
  0x42   :  { %p715_p0 = por %p714_p13, %p713_p12 }
  0x44   :  { %p716_p1 = pnand %p715_p0, %p709_p11 }
  0x46   :  { %719 = shalt.err (!%p716_p1)
}
  0x47   :  { %76 = dma.hbm_to_vmem [thread:$0]  %s952_s5, 16, %s74_s13, [#allocation9]  }
  0x48   :  { %s728_s1 = scalar_lea.vmem %s96_s15, 16  ;;  %s732_s2 = scalar_lea.vmem %s96_s15, 32 }
  0x49   :  { %p729_p2 = scmp.ne.s32.totalorder %s96_s15, %s728_s1  ;;  %p733_p3 = scmp.lt.s32.totalorder %s96_s15, %s96_s15 }
  0x4a   :  { %p734_p4 = scmp.lt.s32.totalorder %s732_s2, %s728_s1 }
  0x4c   :  { %p735_p5 = por %p734_p4, %p733_p3 }
  0x4e   :  { %p736_p6 = pnand %p735_p5, %p729_p2 }
  0x50   :  { %739 = shalt.err (!%p736_p6)
}
  0x51   :  { %98 = dma.hbm_to_vmem [thread:$0]  %s955_s8, 16, %s96_s15, [#allocation12]  }
  0x52   :  { %s801_s21 = smov [#allocation14]  }
  0x53   :  { %s105_s22 = sshll.u32 %s801_s21, 4  ;;  %s106_s22 = int_to_ptr.vmem [resolvable:$true] %s105_s22 }
  0x54   :  { %s748_s23 = scalar_lea.vmem %s106_s22, 16  ;;  %s752_s24 = scalar_lea.vmem %s106_s22, 32 }
  0x55   :  { %p749_p7 = scmp.ne.s32.totalorder %s106_s22, %s748_s23  ;;  %p753_p8 = scmp.lt.s32.totalorder %s106_s22, %s106_s22 }
  0x56   :  { %p754_p9 = scmp.lt.s32.totalorder %s752_s24, %s748_s23 }
  0x58   :  { %p755_p10 = por %p754_p9, %p753_p8 }
  0x5a   :  { %p756_p11 = pnand %p755_p10, %p749_p7 }
  0x5c   :  { %759 = shalt.err (!%p756_p11)
}
  0x5d   :  { %108 = dma.hbm_to_vmem [thread:$0]  %s956_s9, 16, %s106_s22, [#allocation15]  }
  0x5e   :  { %780 = dma.done.wait [#allocation3], 64  }
  0x5f   :  { %781 = vsyncadd [#allocation3], 4294967232 }
  0x60   :  { %782 = dma.done.wait [#allocation6], 144  }
  0x61   :  { %783 = vsyncadd [#allocation6], 4294967152 }
  0x62   :  { %784 = dma.done.wait [#allocation9], 32  }
  0x63   :  { %785 = vsyncadd [#allocation9], 4294967264 }
  0x64   :  { %786 = dma.done.wait [#allocation12], 32  }
  0x65   :  { %787 = vsyncadd [#allocation12], 4294967264 }
  0x66   :  { %788 = dma.done.wait [#allocation15], 16  }
  0x67   :  { %789 = vsyncadd [#allocation15], 4294967280  ;;  %v802_v0 = vmov 0.0   ;;  %vm803_vm0 = vmmov 0   ;;  %v587_v1 = vld [vmem:[#allocation5] sm:$0xff]   ;;  %vm147_vm1 = vcmask 130048   ;;  %v217_v28 = vlaneseq }
  0x68   :  { %544 = vmatprep.subr.bf16.mxu0 %v802_v0  ;;  %546 = vmatprep.mubr.msk.bf16.mxu0 %vm803_vm0, %v802_v0  ;;  %v138_v2 = vld [vmem:[#allocation2] sm:$0xf]  ;;  %v588_v3 = vld [vmem:[%s951_s4 + $0x8] sm:$0xff]   ;;  %vm193_vm2 = vcmask 261120   ;;  %s804_s15 = smov [#allocation16]   ;;  %vm497_vm3 = vcmask 64512  }
  0x69   :  { %550 = vmatprep.subr.bf16.mxu1 %v802_v0  ;;  %554 = vmatprep.mubr.msk.bf16.mxu1 %vm803_vm0, %v802_v0  ;;  %v589_v4 = vld [vmem:[%s951_s4] sm:$0xff]   ;;  %v218_v29 = vshrl.u32 %v217_v28, 7  ;;  %v191_v30 = vld [vmem:[#allocation7] sm:$0x1]  ;;  %v520_v35 = vld [vmem:[#allocation8] ss:$0 sm:$0xff] }
  0x6a   :  { %545 = vmatpush3.bf16.msra.mxu0 %v587_v1  ;;  %551 = vmatpush3.bf16.msra.mxu1 %v588_v3  ;;  %v590_v41 = vld [vmem:[%s954_s7 + $0x8] sm:$0xff]   ;;  %v591_v42 = vld [vmem:[%s954_s7] sm:$0xff]   ;;  %v292_v3 = vld [vmem:[#allocation10] sm:$0x1]  ;;  %s505_s16 = sshll.u32 %s804_s15, 4  ;;  %s506_s16 = int_to_ptr.vmem [resolvable:$true] %s505_s16 }
  0x6b   :  { %558 = vmatprep.subr.bf16.mxu0 %v802_v0  ;;  %552 = vmatprep.subr.bf16.mxu1 %v802_v0  ;;  %v913_v31 = vsub.s32 0, %v218_v29  ;;  %s760_s0 = scalar_lea.vmem %s506_s16, 128  ;;  %p765_p13 = scmp.lt.s32.totalorder %s506_s16, %s506_s16 }
  0x6c   :  { %p761_p12 = scmp.ne.s32.totalorder %s506_s16, %s760_s0  ;;  %p766_p0 = scmp.lt.s32.totalorder %s760_s0, %s760_s0 }
  0x6d   :  { %547 = vmatmul.mubr.msk.bf16.vlgmr.msra.gmra.mxu0 %vm147_vm1, %v138_v2 }
  0x6e   :  { %562 = vmatprep.mubr.msk.bf16.mxu0 %vm803_vm0, %v802_v0  ;;  %553 = vmatpush3.bf16.msra.mxu1 %v589_v4  ;;  %p767_p1 = por %p766_p0, %p765_p13 }
  0x6f   :  { %566 = vmatprep.subr.bf16.mxu1 %v802_v0  ;;  %559 = vmatpush3.bf16.msra.mxu0 %v590_v41 }
  0x70   :  { %560 = vmatprep.subr.bf16.mxu0 %v802_v0  ;;  %p768_p2 = pnand %p767_p1, %p761_p12 }
  0x73   :  { %561 = vmatpush3.bf16.msra.mxu0 %v591_v42  ;;  %v528_v42 = vld [vmem:[#allocation14] ss:$0 sm:$0xff] }
 0x12d   :  { %v185_v5 = vpop.f32.mrf.mxu0 }
 0x12e   :  { %v194_v6 = vsel %vm193_vm2, %v185_v5, 0.0 }
 0x12f   :  { %v195_v7 = vrot.slane %v194_v6, 4  ;;  %v548_v8 = vpop.f32.mrf.mxu0 }
 0x131   :  { %v196_v9 = vadd.f32 %v195_v7, %v194_v6  ;;  %v188_v10 = vpop.f32.mrf.mxu0  ;;  %v524_v7 = vld [vmem:[#allocation11] ss:$0 sm:$0xff] }
 0x133   :  { %v197_v11 = vrot.slane %v196_v9, 2  ;;  %v549_v12 = vpop.f32.mrf.mxu0 }
 0x135   :  { %v198_v13 = vadd.f32 %v197_v11, %v196_v9 }
 0x137   :  { %v199_v14 = vrot.slane %v198_v13, 1 }
 0x139   :  { %v200_v15 = vadd.f32 %v199_v14, %v198_v13  ;;  %v592_v13 = vld [vmem:[%s957_s10 + $0x8] sm:$0xff]   ;;  %v593_v14 = vld [vmem:[%s957_s10] sm:$0xff]  }
 0x13b   :  { %v202_v16 = vmul.f32 0.125, %v200_v15 }
 0x13d   :  { %v203_v17 = vsub.f32 %v185_v5, %v202_v16 }
 0x13f   :  { %v204_v18 = vmul.f32 %v203_v17, %v203_v17 }
 0x141   :  { %v205_v19 = vsel %vm193_vm2, %v204_v18, 0.0 }
 0x142   :  { %v206_v20 = vrot.slane %v205_v19, 4 }
 0x144   :  { %v207_v21 = vadd.f32 %v206_v20, %v205_v19 }
 0x146   :  { %v208_v22 = vrot.slane %v207_v21, 2 }
 0x148   :  { %v209_v23 = vadd.f32 %v208_v22, %v207_v21 }
 0x14a   :  { %v210_v24 = vrot.slane %v209_v23, 1 }
 0x14c   :  { %v211_v25 = vadd.f32 %v210_v24, %v209_v23 }
 0x14e   :  { %v212_v26 = vmul.f32 0.125, %v211_v25 }
 0x150   :  { %v213_v27 = vadd.f32 1e-05, %v212_v26 }
 0x152   :  { %594 = vrsqrt.f32 %v213_v27 }
 0x15f   :  { %v595_v32 = vpop.eup %594 }
 0x160   :  { %v215_v33 = vmul.f32 %v595_v32, %v191_v30 }
 0x162   :  { %v220_v34 = vrot.slane %v215_v33, %v913_v31 }
 0x164   :  { %v222_v36 = vmul.f32 %v220_v34, %v203_v17 }
 0x166   :  { %v229_v37 = vadd.f32 %v520_v35, %v222_v36 }
 0x168   :  { %v230_v38 = vmul.f32 0.2, %v229_v37 }
 0x16a   :  { %v231_v39 = vmax.f32 %v229_v37, %v230_v38  ;;  %v391_v38 = vld [vmem:[#allocation13] sm:$0x1] }
 0x16c   :  { %v232_v40 = vpack.c.bf16 %v231_v39, %v231_v39 }
 0x16e   :  { %555 = vmatmul.mubr.msk.bf16.vlgmr.msra.gmra.mxu1 %vm193_vm2, %v232_v40 }
 0x16f   :  { %570 = vmatprep.mubr.msk.bf16.mxu1 %vm803_vm0, %v802_v0  ;;  %567 = vmatpush3.bf16.msra.mxu1 %v592_v13 }
 0x170   :  { %568 = vmatprep.subr.bf16.mxu1 %v802_v0 }
 0x173   :  { %569 = vmatpush3.bf16.msra.mxu1 %v593_v14 }
 0x22e   :  { %v286_v43 = vpop.f32.mrf.mxu1 }
 0x22f   :  { %v294_v44 = vsel %vm193_vm2, %v286_v43, 0.0 }
 0x230   :  { %v295_v45 = vrot.slane %v294_v44, 4  ;;  %v556_v46 = vpop.f32.mrf.mxu1 }
 0x232   :  { %v296_v47 = vadd.f32 %v295_v45, %v294_v44  ;;  %v289_v48 = vpop.f32.mrf.mxu1 }
 0x233   :  { %v529_v48 = vld [vmem:[%s958_s11] ss:$0 sm:$0xff] }
 0x234   :  { %v297_v49 = vrot.slane %v296_v47, 2  ;;  %v557_v50 = vpop.f32.mrf.mxu1 }
 0x236   :  { %v298_v51 = vadd.f32 %v297_v49, %v296_v47 }
 0x238   :  { %v299_v52 = vrot.slane %v298_v51, 1 }
 0x23a   :  { %v300_v53 = vadd.f32 %v299_v52, %v298_v51 }
 0x23c   :  { %v301_v54 = vmul.f32 0.125, %v300_v53 }
 0x23e   :  { %v302_v55 = vsub.f32 %v286_v43, %v301_v54 }
 0x240   :  { %v303_v56 = vmul.f32 %v302_v55, %v302_v55 }
 0x242   :  { %v304_v57 = vsel %vm193_vm2, %v303_v56, 0.0 }
 0x243   :  { %v305_v58 = vrot.slane %v304_v57, 4 }
 0x245   :  { %v306_v59 = vadd.f32 %v305_v58, %v304_v57 }
 0x247   :  { %v307_v60 = vrot.slane %v306_v59, 2 }
 0x249   :  { %v308_v61 = vadd.f32 %v307_v60, %v306_v59 }
 0x24b   :  { %v309_v62 = vrot.slane %v308_v61, 1 }
 0x24d   :  { %v310_v63 = vadd.f32 %v309_v62, %v308_v61 }
 0x24f   :  { %v311_v1 = vmul.f32 0.125, %v310_v63 }
 0x251   :  { %v312_v2 = vadd.f32 1e-05, %v311_v1 }
 0x253   :  { %596 = vrsqrt.f32 %v312_v2 }
 0x260   :  { %v597_v4 = vpop.eup %596 }
 0x261   :  { %v314_v5 = vmul.f32 %v597_v4, %v292_v3 }
 0x263   :  { %v319_v6 = vrot.slane %v314_v5, %v913_v31 }
 0x265   :  { %v321_v8 = vmul.f32 %v319_v6, %v302_v55 }
 0x267   :  { %v328_v9 = vadd.f32 %v524_v7, %v321_v8 }
 0x269   :  { %v329_v10 = vmul.f32 0.2, %v328_v9 }
 0x26b   :  { %v330_v11 = vmax.f32 %v328_v9, %v329_v10 }
 0x26d   :  { %v331_v12 = vpack.c.bf16 %v330_v11, %v330_v11 }
 0x26f   :  { %563 = vmatmul.mubr.msk.bf16.vlgmr.msra.gmra.mxu0 %vm193_vm2, %v331_v12 }
 0x32f   :  { %v385_v15 = vpop.f32.mrf.mxu0 }
 0x330   :  { %v393_v16 = vsel %vm193_vm2, %v385_v15, 0.0 }
 0x331   :  { %v394_v17 = vrot.slane %v393_v16, 4  ;;  %v564_v18 = vpop.f32.mrf.mxu0 }
 0x333   :  { %v395_v19 = vadd.f32 %v394_v17, %v393_v16  ;;  %v388_v20 = vpop.f32.mrf.mxu0 }
 0x335   :  { %v396_v21 = vrot.slane %v395_v19, 2  ;;  %v565_v22 = vpop.f32.mrf.mxu0 }
 0x337   :  { %v397_v23 = vadd.f32 %v396_v21, %v395_v19 }
 0x339   :  { %v398_v24 = vrot.slane %v397_v23, 1 }
 0x33b   :  { %v399_v25 = vadd.f32 %v398_v24, %v397_v23 }
 0x33d   :  { %v400_v26 = vmul.f32 0.125, %v399_v25 }
 0x33f   :  { %v401_v27 = vsub.f32 %v385_v15, %v400_v26 }
 0x341   :  { %v402_v0 = vmul.f32 %v401_v27, %v401_v27 }
 0x343   :  { %v403_v28 = vsel %vm193_vm2, %v402_v0, 0.0 }
 0x344   :  { %v404_v29 = vrot.slane %v403_v28, 4 }
 0x346   :  { %v405_v30 = vadd.f32 %v404_v29, %v403_v28 }
 0x348   :  { %v406_v32 = vrot.slane %v405_v30, 2 }
 0x34a   :  { %v407_v33 = vadd.f32 %v406_v32, %v405_v30 }
 0x34c   :  { %v408_v34 = vrot.slane %v407_v33, 1 }
 0x34e   :  { %v409_v35 = vadd.f32 %v408_v34, %v407_v33 }
 0x350   :  { %v410_v36 = vmul.f32 0.125, %v409_v35 }
 0x352   :  { %v411_v37 = vadd.f32 1e-05, %v410_v36 }
 0x354   :  { %598 = vrsqrt.f32 %v411_v37 }
 0x361   :  { %v599_v39 = vpop.eup %598 }
 0x362   :  { %v413_v40 = vmul.f32 %v599_v39, %v391_v38 }
 0x364   :  { %v418_v41 = vrot.slane %v413_v40, %v913_v31 }
 0x366   :  { %v420_v43 = vmul.f32 %v418_v41, %v401_v27 }
 0x368   :  { %v427_v44 = vadd.f32 %v528_v42, %v420_v43 }
 0x36a   :  { %v428_v45 = vmul.f32 0.2, %v427_v44 }
 0x36c   :  { %v429_v46 = vmax.f32 %v427_v44, %v428_v45 }
 0x36e   :  { %v430_v47 = vpack.c.bf16 %v429_v46, %v429_v46 }
 0x370   :  { %571 = vmatmul.mubr.msk.bf16.vlgmr.msra.gmra.mxu1 %vm193_vm2, %v430_v47 }
 0x430   :  { %v491_v49 = vpop.f32.mrf.mxu1 }
 0x431   :  { %v492_v50 = vadd.f32 %v529_v48, %v491_v49 }
 0x432   :  { %v572_v51 = vpop.f32.mrf.mxu1 }
 0x433   :  { %498 = vst.msk [vmem:[#allocation16] sm:$0xff] %vm497_vm3, %v492_v50 }
 0x434   :  { %v494_v31 = vpop.f32.mrf.mxu1 }
 0x435   :  { %771 = shalt.err (!%p768_p2)
}
 0x436   :  { %508 = dma.vmem_to_hbm [thread:$0]  %s506_s16, 128, %s959_s12, [#allocation4]   ;;  %v573_v52 = vpop.f32.mrf.mxu1 }
 0x437   :  { %790 = dma.done.wait [#allocation4], 128  }
 0x438   :  { %791 = vsyncadd [#allocation4], 4294967168 }
 0x439   :  { %512 = vsyncpa [#allocation3], 1 }
 0x43a   :  { %513 = vsyncpa [#allocation6], 1 }
 0x43b   :  { %514 = vsyncpa [#allocation9], 1 }
 0x43c   :  { %515 = vsyncpa [#allocation12], 1 }
 0x43d   :  { %516 = vsyncpa [#allocation15], 1 }
 0x43e   :  { %517 = vsyncpa [#allocation4], 1 }

</bundles_post_ra>
